<compile_context>
chip_gen: v6e
topology: v6e:2x2x1
jax: 0.10.0
libtpu: 0.0.40
codegen_flags: <defaults>
</compile_context>

<pallas_src>
import functools

import jax
import jax.numpy as jnp
from jax import lax
from jax.experimental import pallas as pl
from jax.experimental.pallas import tpu as pltpu

_LANE = 128


def _linear_kernel(x_ref, w_ref, b_ref, o_ref):
    # x_ref: [TM, hid], w_ref: [out_pad, hid] (torch layout), b_ref: [1, out_pad]
    # y = x @ w.T + b   computed as dot_general contracting dim 1 of both.
    acc = lax.dot_general(
        x_ref[...], w_ref[...],
        dimension_numbers=(((1,), (1,)), ((), ())),
        preferred_element_type=jnp.float32,
    )
    o_ref[...] = (acc + b_ref[...]).astype(o_ref.dtype)


def prepare_params(weight, bias):
    """One-time parameter prep (outside the hot forward path).

    Pads out_dim up to a multiple of 128 with zeros so kernel stores are
    lane-dense. weight stays in torch layout [out_pad, hid].
    """
    out_dim, hid = weight.shape
    out_pad = max(_LANE, pl.cdiv(out_dim, _LANE) * _LANE)
    w_p = jnp.zeros((out_pad, hid), weight.dtype).at[:out_dim, :].set(weight)
    b_p = jnp.zeros((1, out_pad), bias.dtype).at[0, :out_dim].set(bias)
    return w_p, b_p, out_dim


@functools.partial(jax.jit, static_argnames=("out_dim", "tm_max"))
def logreg_forward(x, w_padded, b_padded, *, out_dim, tm_max=512):
    """y = x @ weight.T + bias   (torch nn.Linear semantics).

    x:        [N, hid] float32
    w_padded: [out_pad, hid]  (torch layout, zero-padded rows)
    b_padded: [1, out_pad]
    returns:  [N, out_dim] float32
    """
    n, hid = x.shape
    out_pad = w_padded.shape[0]

    if n <= tm_max:
        # Single tile covering all rows (block == full dim, so no (8,128)
        # divisibility requirement on the row dim).
        tm = n
        n_pad = n
    else:
        # Tile rows; TM is a multiple of 8 (f32 sublane) and amortizes the
        # ~0.35us per-step overhead.  Tiny per-tile VMEM footprint
        # (2*(TM*hid + TM*out_pad)*4B + out_pad*hid*4B) fits every generation
        # (v5e 16 MiB scoped .. v7x 64 MiB physical) with big headroom.
        tm = tm_max
        n_pad = pl.cdiv(n, tm) * tm
        if n_pad != n:
            x = jnp.pad(x, ((0, n_pad - n), (0, 0)))

    grid = (n_pad // tm,)

    y_pad = pl.pallas_call(
        _linear_kernel,
        out_shape=jax.ShapeDtypeStruct((n_pad, out_pad), x.dtype),
        grid=grid,
        in_specs=[
            pl.BlockSpec((tm, hid), lambda i: (i, 0)),        # x row tile
            pl.BlockSpec((out_pad, hid), lambda i: (0, 0)),   # weight, VMEM-resident
            pl.BlockSpec((1, out_pad), lambda i: (0, 0)),     # bias, VMEM-resident
        ],
        out_specs=pl.BlockSpec((tm, out_pad), lambda i: (i, 0)),
        compiler_params=pltpu.CompilerParams(
            dimension_semantics=("parallel",),  # row axis shards across v7x's 2 TCs
        ),
    )(x, w_padded, b_padded)

    return y_pad[:n, :out_dim]


if __name__ == "__main__":
    key = jax.random.PRNGKey(0)
    k_x, k_w, k_b = jax.random.split(key, 3)

    batch, hid_dim, out_dim = 8, 32, 8

    # Deterministic parameter init mimicking torch.nn.Linear default
    # (uniform in [-1/sqrt(hid_dim), 1/sqrt(hid_dim)]).
    bound = 1.0 / jnp.sqrt(jnp.float32(hid_dim))
    weight = jax.random.uniform(k_w, (out_dim, hid_dim),
                                minval=-bound, maxval=bound,
                                dtype=jnp.float32)
    bias = jax.random.uniform(k_b, (out_dim,),
                              minval=-bound, maxval=bound,
                              dtype=jnp.float32)

    x = jax.random.normal(k_x, (batch, hid_dim), dtype=jnp.float32)

    # One-time param prep (pad out_dim for lane-dense stores).
    w_padded, b_padded, out_dim = prepare_params(weight, bias)

    y = logreg_forward(x, w_padded, b_padded, out_dim=out_dim)
    y = jax.block_until_ready(y)

    # Reference check in plain JAX (torch nn.Linear semantics).
    y_ref = x @ weight.T + bias
    assert y.shape == (batch, out_dim)
    assert jnp.allclose(y, y_ref, atol=1e-5, rtol=1e-5)

    # Also exercise the tiled (N > tm_max) path for the row-grid code.
    big_n = 1537  # intentionally not a multiple of the tile size
    x_big = jax.random.normal(k_x, (big_n, hid_dim), dtype=jnp.float32)
    y_big = jax.block_until_ready(
        logreg_forward(x_big, w_padded, b_padded, out_dim=out_dim))
    y_big_ref = x_big @ weight.T + bias
    assert y_big.shape == (big_n, out_dim)
    assert jnp.allclose(y_big, y_big_ref, atol=1e-5, rtol=1e-5)

    print("KERNEL_OK")
</pallas_src>

<mosaic_0001>
module attributes {stable_mosaic.version = 11 : i64} {
  func.func @_linear_kernel(%arg0: i32, %arg1: memref<8x32xf32, #tpu.memory_space<vmem>>, %arg2: memref<128x32xf32, #tpu.memory_space<vmem>>, %arg3: memref<1x128xf32, #tpu.memory_space<vmem>>, %arg4: memref<8x128xf32, #tpu.memory_space<vmem>>) attributes {dimension_semantics = [#tpu.dimension_semantics<parallel>], iteration_bounds = array<i64: 1>, scalar_prefetch = 0 : i64, scratch_operands = 0 : i64, tpu.core_type = #tpu.core_type<tc>, window_params = [{transform_indices = @transform_0, window_bounds = array<i64: 8, 32>}, {pipeline_mode = #tpu.pipeline_mode<synchronous>, transform_indices = @transform_1, window_bounds = array<i64: 128, 32>}, {pipeline_mode = #tpu.pipeline_mode<synchronous>, transform_indices = @transform_2, window_bounds = array<i64: 1, 128>}, {transform_indices = @transform_3, window_bounds = array<i64: 8, 128>}]} {
    %c0 = arith.constant 0 : index
    %c0_0 = arith.constant 0 : index
    %0 = vector.load %arg1[%c0, %c0_0] : memref<8x32xf32, #tpu.memory_space<vmem>>, vector<8x32xf32>
    %c0_1 = arith.constant 0 : index
    %c0_2 = arith.constant 0 : index
    %1 = vector.load %arg2[%c0_1, %c0_2] : memref<128x32xf32, #tpu.memory_space<vmem>>, vector<128x32xf32>
    %cst = arith.constant dense<0.000000e+00> : vector<8x128xf32>
    %2 = tpu.matmul %0, %1, %cst {dimension_numbers = #tpu.dot_dimension_numbers<[1], [1], [0], [0], [0, 0, 1, 0], [], []>} : vector<8x32xf32>, vector<128x32xf32>, vector<8x128xf32> -> vector<8x128xf32>
    %c0_3 = arith.constant 0 : index
    %c0_4 = arith.constant 0 : index
    %3 = vector.load %arg3[%c0_3, %c0_4] : memref<1x128xf32, #tpu.memory_space<vmem>>, vector<1x128xf32>
    %4 = vector.broadcast %3 : vector<1x128xf32> to vector<8x128xf32>
    %5 = arith.addf %2, %4 : vector<8x128xf32>
    %c0_5 = arith.constant 0 : index
    %c0_6 = arith.constant 0 : index
    %6 = vector.load %arg4[%c0_5, %c0_6] : memref<8x128xf32, #tpu.memory_space<vmem>>, vector<8x128xf32>
    tpu.vector_store %arg4[%c0_5, %c0_6], %5 {strides = array<i32>} : memref<8x128xf32, #tpu.memory_space<vmem>>, vector<8x128xf32>,
    return
  }
  func.func @transform_0(%arg0: i32) -> (i32, i32) {
    %c0_i32 = arith.constant 0 : i32
    %c0_i32_0 = arith.constant 0 : i32
    return %arg0, %c0_i32 : i32, i32
  }
  func.func @transform_1(%arg0: i32) -> (i32, i32) {
    %c0_i32 = arith.constant 0 : i32
    %c0_i32_0 = arith.constant 0 : i32
    %c0_i32_1 = arith.constant 0 : i32
    return %c0_i32, %c0_i32_0 : i32, i32
  }
  func.func @transform_2(%arg0: i32) -> (i32, i32) {
    %c0_i32 = arith.constant 0 : i32
    %c0_i32_0 = arith.constant 0 : i32
    %c0_i32_1 = arith.constant 0 : i32
    return %c0_i32, %c0_i32_0 : i32, i32
  }
  func.func @transform_3(%arg0: i32) -> (i32, i32) {
    %c0_i32 = arith.constant 0 : i32
    %c0_i32_0 = arith.constant 0 : i32
    return %arg0, %c0_i32 : i32, i32
  }
}

</mosaic_0001>

<bundles_post_ra>
// kernel: logreg_forward.1
= control target key start
LH: loop header
LB: loop body
LE: loop exit
PB: predicated region body
PF: predicated region fallthrough
CT: control target
= control target key end

     0   :  { %vm39_vm0 = vcmask 261120   ;;  %v271_v1 = vmov 0.0   ;;  %vm272_vm1 = vmmov 0   ;;  %s368_s0 = inlined_call_operand.vmem [shape: f32[8,32], index: 0, kind: input, shape index: {}]   ;;  %s369_s1 = inlined_call_operand.vmem [shape: f32[128,32], index: 1, kind: input, shape index: {}]   ;;  %s370_s2 = inlined_call_operand.vmem [shape: f32[1,128], index: 2, kind: input, shape index: {}]   ;;  %s371_s3 = inlined_call_operand.hbm [shape: f32[8,128], index: 3, kind: output, shape index: {}]  }
   0x1   :  { %v31_v0 = vld [vmem:[%s369_s1 + $0x78] sm:$0xff]  ;;  %211 = vmatprep.subr.mxu0 %v271_v1  ;;  %243 = vmatprep.mubr.msk.f32.mxu0 %vm272_vm1, %v271_v1  ;;  %v30_v2 = vld [vmem:[%s369_s1 + $0x70] sm:$0xff] }
   0x2   :  { %212 = vmatpush3.xpose.msk.msra.mxu0 %vm39_vm0, %v31_v0 }
   0x3   :  { %213 = vmatprep.subr.mxu0 %v271_v1 }
   0x6   :  { %214 = vmatpush3.xpose.msk.msra.mxu0 %vm39_vm0, %v30_v2 }
   0x7   :  { %8 = vsyncpa [#allocation3], 0  ;;  %215 = vmatprep.subr.mxu0 %v271_v1  ;;  %v29_v3 = vld [vmem:[%s369_s1 + $0x68] sm:$0xff]  ;;  %v28_v4 = vld [vmem:[%s369_s1 + $0x60] sm:$0xff]  ;;  %s273_s21 = smov [#allocation2]  }
   0x8   :  { %v27_v5 = vld [vmem:[%s369_s1 + $0x58] sm:$0xff]  ;;  %v26_v6 = vld [vmem:[%s369_s1 + $0x50] sm:$0xff]  ;;  %v25_v7 = vld [vmem:[%s369_s1 + $0x48] sm:$0xff]  ;;  %s168_s22 = sshll.u32 %s273_s21, 4  ;;  %s169_s22 = int_to_ptr.vmem [resolvable:$true] %s168_s22 }
   0x9   :  { %v24_v8 = vld [vmem:[%s369_s1 + $0x40] sm:$0xff]  ;;  %v23_v9 = vld [vmem:[%s369_s1 + $0x38] sm:$0xff]  ;;  %v22_v10 = vld [vmem:[%s369_s1 + $0x30] sm:$0xff]  ;;  %p254_p1 = scmp.lt.s32.totalorder %s169_s22, %s169_s22 }
   0xa   :  { %216 = vmatpush3.xpose.msk.msra.mxu0 %vm39_vm0, %v29_v3  ;;  %v21_v11 = vld [vmem:[%s369_s1 + $0x28] sm:$0xff]  ;;  %v20_v12 = vld [vmem:[%s369_s1 + $0x20] sm:$0xff]  ;;  %v19_v13 = vld [vmem:[%s369_s1 + $0x18] sm:$0xff] }
   0xb   :  { %217 = vmatprep.subr.mxu0 %v271_v1  ;;  %v18_v14 = vld [vmem:[%s369_s1 + $0x10] sm:$0xff]  ;;  %v17_v15 = vld [vmem:[%s369_s1 + $0x8] sm:$0xff]  ;;  %v16_v16 = vld [vmem:[%s369_s1] sm:$0xff]  ;;  %s249_s1 = scalar_lea.vmem %s169_s22, 128 }
   0xc   :  { %v15_v17 = vld [vmem:[%s368_s0] sm:$0xff]  ;;  %p250_p0 = scmp.ne.s32.totalorder %s169_s22, %s249_s1  ;;  %p255_p2 = scmp.lt.s32.totalorder %s249_s1, %s249_s1 }
   0xd   :  { %v176_v18 = vld [vmem:[%s370_s2] ss:$0 sm:$0xff] }
   0xe   :  { %218 = vmatpush3.xpose.msk.msra.mxu0 %vm39_vm0, %v28_v4  ;;  %p256_p3 = por %p255_p2, %p254_p1 }
   0xf   :  { %219 = vmatprep.subr.mxu0 %v271_v1 }
  0x10   :  { %p257_p4 = pnand %p256_p3, %p250_p0 }
  0x12   :  { %220 = vmatpush3.xpose.msk.msra.mxu0 %vm39_vm0, %v27_v5 }
  0x13   :  { %221 = vmatprep.subr.mxu0 %v271_v1 }
  0x16   :  { %222 = vmatpush3.xpose.msk.msra.mxu0 %vm39_vm0, %v26_v6 }
  0x17   :  { %223 = vmatprep.subr.mxu0 %v271_v1 }
  0x1a   :  { %224 = vmatpush3.xpose.msk.msra.mxu0 %vm39_vm0, %v25_v7 }
  0x1b   :  { %225 = vmatprep.subr.mxu0 %v271_v1 }
  0x1e   :  { %226 = vmatpush3.xpose.msk.msra.mxu0 %vm39_vm0, %v24_v8 }
  0x1f   :  { %227 = vmatprep.subr.mxu0 %v271_v1 }
  0x22   :  { %228 = vmatpush3.xpose.msk.msra.mxu0 %vm39_vm0, %v23_v9 }
  0x23   :  { %229 = vmatprep.subr.mxu0 %v271_v1 }
  0x26   :  { %230 = vmatpush3.xpose.msk.msra.mxu0 %vm39_vm0, %v22_v10 }
  0x27   :  { %231 = vmatprep.subr.mxu0 %v271_v1 }
  0x2a   :  { %232 = vmatpush3.xpose.msk.msra.mxu0 %vm39_vm0, %v21_v11 }
  0x2b   :  { %233 = vmatprep.subr.mxu0 %v271_v1 }
  0x2e   :  { %234 = vmatpush3.xpose.msk.msra.mxu0 %vm39_vm0, %v20_v12 }
  0x2f   :  { %235 = vmatprep.subr.mxu0 %v271_v1 }
  0x32   :  { %236 = vmatpush3.xpose.msk.msra.mxu0 %vm39_vm0, %v19_v13 }
  0x33   :  { %237 = vmatprep.subr.mxu0 %v271_v1 }
  0x36   :  { %238 = vmatpush3.xpose.msk.msra.mxu0 %vm39_vm0, %v18_v14 }
  0x37   :  { %239 = vmatprep.subr.mxu0 %v271_v1 }
  0x3a   :  { %240 = vmatpush3.xpose.msk.msra.mxu0 %vm39_vm0, %v17_v15 }
  0x3b   :  { %241 = vmatprep.subr.mxu0 %v271_v1 }
  0x3e   :  { %242 = vmatpush3.xpose.msk.msra.mxu0 %vm39_vm0, %v16_v16 }
  0x41   :  { %244 = vmatmul.mubr.msk.f32.vlgmr.msra.gmra.mxu0 %vm39_vm0, %v15_v17 }
 0x101   :  { %v157_v19 = vpop.f32.mrf.mxu0 }
 0x102   :  { %v158_v20 = vadd.f32 %v176_v18, %v157_v19 }
 0x103   :  { %v245_v21 = vpop.f32.mrf.mxu0 }
 0x104   :  { %161 = vst [vmem:[#allocation2] sm:$0xff] %v158_v20 }
 0x105   :  { %260 = shalt.err (!%p257_p4)
}
 0x106   :  { %171 = dma.vmem_to_hbm [thread:$0]  %s169_s22, 128, %s371_s3, [#allocation3]  }
 0x107   :  { %269 = dma.done.wait [#allocation3], 128  }
 0x108   :  { %270 = vsyncadd [#allocation3], 4294967168 }
 0x109   :  { %175 = vsyncpa [#allocation3], 1 }

</bundles_post_ra>
